<compile_context>
chip_gen: v7x
topology: tpu7x:2x2x1
jax: 0.10.0
libtpu: 0.0.40
codegen_flags: <defaults>
</compile_context>

<pallas_src>
import functools

import jax
import jax.numpy as jnp
from jax.experimental import pallas as pl
from jax.experimental.pallas import tpu as pltpu

_LANE = 128
_SUBLANE = 8


def _round_up(n, m):
    return ((n + m - 1) // m) * m


def _dqn_kernel(n_linear, x_ref, *refs):
    """refs = (w0, b0, w1, b1, ..., w_{L-1}, b_{L-1}, out)."""
    o_ref = refs[2 * n_linear]

    h = x_ref[...]
    if h.dtype != jnp.bfloat16:
        # In-kernel cast: x streams from HBM exactly once (f32), converted to
        # bf16 in-register for the MXU.
        h = h.astype(jnp.bfloat16)

    for i in range(n_linear):
        w = refs[2 * i][...]            # (fin_pad, fout_pad) bf16, resident
        b = refs[2 * i + 1][...]        # (1, fout_pad) f32, broadcasts
        # bf16 x bf16 -> f32 accumulation on the MXU.
        h = jnp.dot(h, w, preferred_element_type=jnp.float32) + b
        if i < n_linear - 1:            # ReLU on all hidden layers
            h = jnp.maximum(h, 0.0).astype(jnp.bfloat16)

    o_ref[...] = h.astype(o_ref.dtype)  # bf16, lane-dense (out_pad = 128)


def dqn_forward(x_nchw, params, *, batch_tile=1024, small_batch_max=128):
    """params: list of (W, b) with W shaped (in, out), b shaped (out,)."""
    B = x_nchw.shape[0]
    x2d = x_nchw.reshape(B, -1)          # nn.Flatten (row-major, like torch)
    n_obs = x2d.shape[1]
    n_actions = params[-1][0].shape[1]
    n_linear = len(params)

    # --- lane-pad feature dims to multiples of 128; weights -> bf16 ---------
    in_pad = _round_up(n_obs, _LANE)
    x_p = x2d                            # keep original dtype; cast in-kernel
    if in_pad != n_obs:
        # TODO(synk): for non-128-aligned n_obs a full-K weight block would
        # avoid this pad; zero padding is numerically exact anyway.
        x_p = jnp.pad(x_p, ((0, 0), (0, in_pad - n_obs)))

    padded = []
    prev_pad = in_pad
    for w, b in params:
        fin, fout = w.shape
        fout_pad = _round_up(fout, _LANE)
        w_p = jnp.zeros((prev_pad, fout_pad), jnp.bfloat16)
        w_p = w_p.at[:fin, :fout].set(w.astype(jnp.bfloat16))
        b_p = jnp.zeros((1, fout_pad), jnp.float32)
        b_p = b_p.at[0, :fout].set(b.astype(jnp.float32))
        padded.append((w_p, b_p))
        prev_pad = fout_pad
    out_pad = prev_pad

    kernel = functools.partial(_dqn_kernel, n_linear)
    param_flat = [t for wb in padded for t in wb]
    vmem_whole = pl.BlockSpec(memory_space=pltpu.MemorySpace.VMEM)

    if B <= small_batch_max:
        # Small batch: everything fits in VMEM; no grid, no pipeline, no
        # double-buffering.  Whole-array operands pinned to VMEM.
        out_p = pl.pallas_call(
            kernel,
            out_shape=jax.ShapeDtypeStruct((B, out_pad), jnp.bfloat16),
            in_specs=[vmem_whole] * (1 + len(param_flat)),
            out_specs=vmem_whole,
        )(x_p, *param_flat)
        return out_p[:, :n_actions].astype(jnp.float32)

    # --- batch-tiled path ----------------------------------------------------
    # Adaptive tile: at least 2 grid steps (both v7x TensorCores busy), tile
    # rows a multiple of 8 sublanes, capped by batch_tile for VMEM safety.
    tm = min(batch_tile, max(_SUBLANE, _round_up(pl.cdiv(B, 2), _SUBLANE)))
    grid = (pl.cdiv(B, tm),)             # ragged last block handled by Pallas

    x_itemsize = x_p.dtype.itemsize
    w_bytes = sum(int(w.size) * w.dtype.itemsize + int(b.size) * b.dtype.itemsize
                  for w, b in padded)
    flops = 2 * B * sum(w.shape[0] * w.shape[1] for w, _ in params)
    bytes_accessed = B * in_pad * x_itemsize + w_bytes + B * out_pad * 2

    in_specs = [pl.BlockSpec((tm, in_pad), lambda i: (i, 0))]
    # Weights/biases: whole-array, single-buffered, resident across the grid.
    in_specs += [vmem_whole] * len(param_flat)

    out_p = pl.pallas_call(
        kernel,
        out_shape=jax.ShapeDtypeStruct((B, out_pad), jnp.bfloat16),
        grid=grid,
        in_specs=in_specs,
        out_specs=pl.BlockSpec((tm, out_pad), lambda i: (i, 0)),
        compiler_params=pltpu.CompilerParams(
            dimension_semantics=("parallel",),
            vmem_limit_bytes=32 * 1024 * 1024),
        cost_estimate=pl.CostEstimate(
            flops=flops, transcendentals=0, bytes_accessed=bytes_accessed),
    )(x_p, *param_flat)
    return out_p[:, :n_actions].astype(jnp.float32)


def init_params(key, n_observations, n_actions, layer_features):
    """Deterministic synthetic init mirroring the module's layer wiring."""
    dims = [n_observations, layer_features[0]]
    for i in range(2, len(layer_features)):
        dims += [layer_features[i - 1], layer_features[i]]
    dims += [layer_features[-1], n_actions]
    params = []
    for li in range(len(dims) // 2):
        fin, fout = dims[2 * li], dims[2 * li + 1]
        key, kw, kb = jax.random.split(key, 3)
        bound = 1.0 / jnp.sqrt(fin)
        w = jax.random.uniform(kw, (fin, fout), jnp.float32, -bound, bound)
        b = jax.random.uniform(kb, (fout,), jnp.float32, -bound, bound)
        params.append((w, b))
    return params


def dqn_reference(x_nchw, params):
    """Pure-JAX f32 reference (matches the PyTorch forward)."""
    h = x_nchw.reshape(x_nchw.shape[0], -1)
    for i, (w, b) in enumerate(params):
        h = h @ w + b
        if i < len(params) - 1:
            h = jnp.maximum(h, 0.0)
    return h


if __name__ == "__main__":
    key = jax.random.PRNGKey(0)

    # Small shapes consistent with the module: NCHW input, flattened to n_obs.
    B, C, H, W = 2, 4, 16, 16
    n_observations = C * H * W                      # 1024
    layer_features = [128, 128, 64]                 # lf[0] == lf[1] (see NOTE)
    n_actions = 8

    key, kx = jax.random.split(key)
    x = jax.random.normal(kx, (B, C, H, W), jnp.float32)
    params = init_params(key, n_observations, n_actions, layer_features)

    # Small-batch (grid-free) path.
    out = jax.block_until_ready(dqn_forward(x, params))
    ref = dqn_reference(x, params)
    assert out.shape == (B, n_actions)
    # bf16 weights/activations/output -> looser tolerance than pure-f32.
    assert jnp.allclose(out, ref, atol=5e-2, rtol=5e-2), (
        float(jnp.max(jnp.abs(out - ref))))

    # Batch-tiled path: grid of 2 "parallel" steps, ragged last block
    # (B=300 -> tm=152, grid=2), resident weights in VMEM.
    Bt = 300
    key, kx2 = jax.random.split(key)
    xt = jax.random.normal(kx2, (Bt, C, H, W), jnp.float32)
    out_t = jax.block_until_ready(dqn_forward(xt, params))
    ref_t = dqn_reference(xt, params)
    assert out_t.shape == (Bt, n_actions)
    assert jnp.allclose(out_t, ref_t, atol=5e-2, rtol=5e-2), (
        float(jnp.max(jnp.abs(out_t - ref_t))))

    print("KERNEL_OK")
</pallas_src>

<mosaic_0001>
module attributes {stable_mosaic.version = 11 : i64} {
  func.func @_dqn_kernel(%arg0: memref<2x1024xf32, #tpu.memory_space<vmem>>, %arg1: memref<1024x128xbf16, #tpu.memory_space<vmem>>, %arg2: memref<1x128xf32, #tpu.memory_space<vmem>>, %arg3: memref<128x128xbf16, #tpu.memory_space<vmem>>, %arg4: memref<1x128xf32, #tpu.memory_space<vmem>>, %arg5: memref<128x128xbf16, #tpu.memory_space<vmem>>, %arg6: memref<1x128xf32, #tpu.memory_space<vmem>>, %arg7: memref<2x128xbf16, #tpu.memory_space<vmem>>) attributes {dimension_semantics = [], scalar_prefetch = 0 : i64, scratch_operands = 0 : i64, tpu.core_type = #tpu.core_type<tc>} {
    %c0 = arith.constant 0 : index
    %c0_0 = arith.constant 0 : index
    %0 = vector.load %arg0[%c0, %c0_0] : memref<2x1024xf32, #tpu.memory_space<vmem>>, vector<2x1024xf32>
    %1 = arith.truncf %0 : vector<2x1024xf32> to vector<2x1024xbf16>
    %c0_1 = arith.constant 0 : index
    %c0_2 = arith.constant 0 : index
    %2 = vector.load %arg1[%c0_1, %c0_2] : memref<1024x128xbf16, #tpu.memory_space<vmem>>, vector<1024x128xbf16>
    %c0_3 = arith.constant 0 : index
    %c0_4 = arith.constant 0 : index
    %3 = vector.load %arg2[%c0_3, %c0_4] : memref<1x128xf32, #tpu.memory_space<vmem>>, vector<1x128xf32>
    %cst = arith.constant dense<0.000000e+00> : vector<2x128xf32>
    %4 = tpu.matmul %1, %2, %cst {dimension_numbers = #tpu.dot_dimension_numbers<[1], [0], [0], [1], [0, 0, 1, 1], [], []>} : vector<2x1024xbf16>, vector<1024x128xbf16>, vector<2x128xf32> -> vector<2x128xf32>
    %5 = vector.broadcast %3 : vector<1x128xf32> to vector<2x128xf32>
    %6 = arith.addf %4, %5 : vector<2x128xf32>
    %cst_5 = arith.constant 0.000000e+00 : f32
    %7 = vector.broadcast %cst_5 : f32 to vector<2x128xf32>
    %8 = arith.maximumf %6, %7 : vector<2x128xf32>
    %9 = arith.truncf %8 : vector<2x128xf32> to vector<2x128xbf16>
    %c0_6 = arith.constant 0 : index
    %c0_7 = arith.constant 0 : index
    %10 = vector.load %arg3[%c0_6, %c0_7] : memref<128x128xbf16, #tpu.memory_space<vmem>>, vector<128x128xbf16>
    %c0_8 = arith.constant 0 : index
    %c0_9 = arith.constant 0 : index
    %11 = vector.load %arg4[%c0_8, %c0_9] : memref<1x128xf32, #tpu.memory_space<vmem>>, vector<1x128xf32>
    %cst_10 = arith.constant dense<0.000000e+00> : vector<2x128xf32>
    %12 = tpu.matmul %9, %10, %cst_10 {dimension_numbers = #tpu.dot_dimension_numbers<[1], [0], [0], [1], [0, 0, 1, 1], [], []>} : vector<2x128xbf16>, vector<128x128xbf16>, vector<2x128xf32> -> vector<2x128xf32>
    %13 = vector.broadcast %11 : vector<1x128xf32> to vector<2x128xf32>
    %14 = arith.addf %12, %13 : vector<2x128xf32>
    %cst_11 = arith.constant 0.000000e+00 : f32
    %15 = vector.broadcast %cst_11 : f32 to vector<2x128xf32>
    %16 = arith.maximumf %14, %15 : vector<2x128xf32>
    %17 = arith.truncf %16 : vector<2x128xf32> to vector<2x128xbf16>
    %c0_12 = arith.constant 0 : index
    %c0_13 = arith.constant 0 : index
    %18 = vector.load %arg5[%c0_12, %c0_13] : memref<128x128xbf16, #tpu.memory_space<vmem>>, vector<128x128xbf16>
    %c0_14 = arith.constant 0 : index
    %c0_15 = arith.constant 0 : index
    %19 = vector.load %arg6[%c0_14, %c0_15] : memref<1x128xf32, #tpu.memory_space<vmem>>, vector<1x128xf32>
    %cst_16 = arith.constant dense<0.000000e+00> : vector<2x128xf32>
    %20 = tpu.matmul %17, %18, %cst_16 {dimension_numbers = #tpu.dot_dimension_numbers<[1], [0], [0], [1], [0, 0, 1, 1], [], []>} : vector<2x128xbf16>, vector<128x128xbf16>, vector<2x128xf32> -> vector<2x128xf32>
    %21 = vector.broadcast %19 : vector<1x128xf32> to vector<2x128xf32>
    %22 = arith.addf %20, %21 : vector<2x128xf32>
    %23 = arith.truncf %22 : vector<2x128xf32> to vector<2x128xbf16>
    %c0_17 = arith.constant 0 : index
    %c0_18 = arith.constant 0 : index
    %24 = vector.load %arg7[%c0_17, %c0_18] : memref<2x128xbf16, #tpu.memory_space<vmem>>, vector<2x128xbf16>
    tpu.vector_store %arg7[%c0_17, %c0_18], %23 {strides = array<i32>} : memref<2x128xbf16, #tpu.memory_space<vmem>>, vector<2x128xbf16>,
    return
  }
}

</mosaic_0001>

<bundles_post_ra>
// kernel: tpu_custom_call.1
= control target key start
LH: loop header
LB: loop body
LE: loop exit
PB: predicated region body
PF: predicated region fallthrough
CT: control target
= control target key end

     0   :  { %12 = vsyncpa [#allocation3], 0  ;;  %s1650_s0 = inlined_call_operand.hbm [shape: f32[2,1024], index: 0, kind: input, shape index: {}]   ;;  %s1651_s1 = inlined_call_operand.hbm [shape: bf16[1024,128], index: 1, kind: input, shape index: {}]   ;;  %s1652_s2 = inlined_call_operand.vmem [shape: f32[1,128], index: 2, kind: input, shape index: {}]   ;;  %s1653_s3 = inlined_call_operand.hbm [shape: bf16[128,128], index: 3, kind: input, shape index: {}]   ;;  %s1654_s4 = inlined_call_operand.vmem [shape: f32[1,128], index: 4, kind: input, shape index: {}]   ;;  %s1655_s5 = inlined_call_operand.hbm [shape: bf16[128,128], index: 5, kind: input, shape index: {}]   ;;  %s1656_s6 = inlined_call_operand.vmem [shape: f32[1,128], index: 6, kind: input, shape index: {}]   ;;  %s1657_s7 = inlined_call_operand.hbm [shape: bf16[2,128], index: 7, kind: output, shape index: {}]  }
   0x1   :  { %13 = vsyncpa [#allocation6], 0 }
   0x2   :  { %14 = vsyncpa [#allocation9], 0 }
   0x3   :  { %15 = vsyncpa [#allocation4], 0  ;;  %s1498_s24 = smov [#allocation5]   ;;  %s1380_s28 = scalar_lea.hbm %s1651_s1, 8192 }
   0x4   :  { %s31_s25 = sshll.u32 %s1498_s24, 4  ;;  %p1381_p0 = scmp.ne.s32.totalorder %s1651_s1, %s1380_s28  ;;  %s32_s25 = int_to_ptr.vmem [resolvable:$true] %s31_s25 }
   0x5   :  { %p1384_p1 = scmp.lt.u32.totalorder %s1380_s28, %s1651_s1 }
   0x7   :  { %p1386_p2 = pnand %p1384_p1, %p1381_p0 }
   0x9   :  { %1389 = shalt.err (!%p1386_p2)
}
   0xa   :  { %s1390_s10 = scalar_lea.vmem %s32_s25, 8192  ;;  %p1395_p4 = scmp.lt.s32.totalorder %s32_s25, %s32_s25 }
   0xb   :  { %p1391_p3 = scmp.ne.s32.totalorder %s32_s25, %s1390_s10  ;;  %p1396_p5 = scmp.lt.s32.totalorder %s1390_s10, %s1390_s10 }
   0xd   :  { %p1397_p6 = por %p1396_p5, %p1395_p4 }
   0xf   :  { %p1398_p7 = pnand %p1397_p6, %p1391_p3 }
  0x11   :  { %1401 = shalt.err (!%p1398_p7)
}
  0x12   :  { %s1499_s11 = smov 64   ;;  %s1500_s12 = smov 4  }
  0x13   :  { %37 = dma.hbm_to_vmem [thread:$0]  %s1651_s1, 8192, %s32_s25, [#allocation6], %s1499_s11, %s1499_s11, %s1500_s12  }
  0x14   :  { %s1501_s15 = smov [#allocation2]   ;;  %s1502_s17 = smov [#allocation7]  }
  0x15   :  { %s22_s16 = sshll.u32 %s1501_s15, 4  ;;  %s45_s18 = sshll.u32 %s1502_s17, 4  ;;  %s23_s16 = int_to_ptr.vmem [resolvable:$true] %s22_s16  ;;  %s46_s18 = int_to_ptr.vmem [resolvable:$true] %s45_s18 }
  0x16   :  { %s1402_s21 = scalar_lea.hbm %s1650_s0, 256 }
  0x17   :  { %p1403_p8 = scmp.ne.s32.totalorder %s1650_s0, %s1402_s21  ;;  %p1406_p9 = scmp.lt.u32.totalorder %s1402_s21, %s1650_s0 }
  0x19   :  { %p1408_p10 = pnand %p1406_p9, %p1403_p8 }
  0x1b   :  { %1411 = shalt.err (!%p1408_p10)
}
  0x1c   :  { %s1412_s1 = scalar_lea.vmem %s23_s16, 256  ;;  %p1417_p12 = scmp.lt.s32.totalorder %s23_s16, %s23_s16 }
  0x1d   :  { %p1413_p11 = scmp.ne.s32.totalorder %s23_s16, %s1412_s1  ;;  %p1418_p13 = scmp.lt.s32.totalorder %s1412_s1, %s1412_s1 }
  0x1f   :  { %p1419_p0 = por %p1418_p13, %p1417_p12 }
  0x21   :  { %p1420_p1 = pnand %p1419_p0, %p1413_p11 }
  0x23   :  { %1423 = shalt.err (!%p1420_p1)
}
  0x24   :  { %25 = dma.hbm_to_vmem [thread:$0]  %s1650_s0, 256, %s23_s16, [#allocation3]  }
  0x25   :  { %s1424_s30 = scalar_lea.hbm %s1653_s3, 1024 }
  0x26   :  { %p1425_p2 = scmp.ne.s32.totalorder %s1653_s3, %s1424_s30  ;;  %p1428_p3 = scmp.lt.u32.totalorder %s1424_s30, %s1653_s3 }
  0x28   :  { %p1430_p4 = pnand %p1428_p3, %p1425_p2 }
  0x2a   :  { %1433 = shalt.err (!%p1430_p4)
}
  0x2b   :  { %s1434_s14 = scalar_lea.vmem %s46_s18, 1024  ;;  %p1439_p6 = scmp.lt.s32.totalorder %s46_s18, %s46_s18 }
  0x2c   :  { %p1435_p5 = scmp.ne.s32.totalorder %s46_s18, %s1434_s14  ;;  %p1440_p7 = scmp.lt.s32.totalorder %s1434_s14, %s1434_s14 }
  0x2e   :  { %p1441_p8 = por %p1440_p7, %p1439_p6 }
  0x30   :  { %p1442_p9 = pnand %p1441_p8, %p1435_p5 }
  0x32   :  { %1445 = shalt.err (!%p1442_p9)
}
  0x33   :  { %51 = dma.hbm_to_vmem [thread:$0]  %s1653_s3, 1024, %s46_s18, [#allocation6], %s1499_s11, %s1499_s11, %s1500_s12  }
  0x34   :  { %s1503_s16 = smov [#allocation8]   ;;  %s1446_s21 = scalar_lea.hbm %s1655_s5, 1024 }
  0x35   :  { %s59_s17 = sshll.u32 %s1503_s16, 4  ;;  %p1447_p10 = scmp.ne.s32.totalorder %s1655_s5, %s1446_s21  ;;  %s60_s17 = int_to_ptr.vmem [resolvable:$true] %s59_s17 }
  0x36   :  { %p1450_p11 = scmp.lt.u32.totalorder %s1446_s21, %s1655_s5 }
  0x38   :  { %p1452_p12 = pnand %p1450_p11, %p1447_p10 }
  0x3a   :  { %1455 = shalt.err (!%p1452_p12)
}
  0x3b   :  { %s1456_s1 = scalar_lea.vmem %s60_s17, 1024  ;;  %p1461_p0 = scmp.lt.s32.totalorder %s60_s17, %s60_s17 }
  0x3c   :  { %p1457_p13 = scmp.ne.s32.totalorder %s60_s17, %s1456_s1  ;;  %p1462_p1 = scmp.lt.s32.totalorder %s1456_s1, %s1456_s1 }
  0x3e   :  { %p1463_p2 = por %p1462_p1, %p1461_p0 }
  0x40   :  { %p1464_p3 = pnand %p1463_p2, %p1457_p13 }
  0x42   :  { %1467 = shalt.err (!%p1464_p3)
}
  0x43   :  { %65 = dma.hbm_to_vmem [thread:$0]  %s1655_s5, 1024, %s60_s17, [#allocation9], %s1499_s11, %s1499_s11, %s1500_s12  }
  0x44   :  { %1490 = dma.done.wait [#allocation3], 256  }
  0x45   :  { %1491 = vsyncadd [#allocation3], 4294967040 }
  0x46   :  { %1492 = dma.done.wait [#allocation6], 9216  }
  0x47   :  { %1493 = vsyncadd [#allocation6], 4294958080 }
  0x48   :  { %1494 = dma.done.wait [#allocation9], 1024  }
  0x49   :  { %1495 = vsyncadd [#allocation9], 4294966272  ;;  %v1298_v0 = vld [vmem:[#allocation5 + $0x40] sm:$0xff]   ;;  %v1302_v4 = vld [vmem:[#allocation5 + $0x48] sm:$0xff]   ;;  %v1504_v22 = vmov 1983009808   ;;  %v89_v24 = vlaneseq }
  0x4a   :  { %v1299_v1 = vld [vmem:[#allocation5 + $0xc0] sm:$0xff]   ;;  %1142 = vmatprep.subr.bf16.mxu0 %v1298_v0  ;;  %v1303_v5 = vld [vmem:[#allocation5 + $0xc8] sm:$0xff]   ;;  %v1306_v8 = vld [vmem:[#allocation5 + $0x50] sm:$0xff]   ;;  %v87_v23 = vunpack.c.l.s4 %v1504_v22  ;;  %vm1506_vm0 = vmmov 0   ;;  %s1507_s28 = smov [#allocation10]  }
  0x4b   :  { %v1300_v2 = vld [vmem:[#allocation5] sm:$0xff]   ;;  %1164 = vmatprep.subr.bf16.mxu1 %v1299_v1  ;;  %v1304_v6 = vld [vmem:[#allocation5 + $0x8] sm:$0xff]   ;;  %v1307_v9 = vld [vmem:[#allocation5 + $0xd0] sm:$0xff]   ;;  %v90_v30 = vshrl.u32 %v89_v24, 7  ;;  %s1048_s29 = sshll.u32 %s1507_s28, 4  ;;  %s1049_s29 = int_to_ptr.vmem [resolvable:$true] %s1048_s29 }
  0x4c   :  { %v1301_v3 = vld [vmem:[#allocation5 + $0x80] sm:$0xff]   ;;  %1143 = vmatpush3.bf16.msra.mxu0 %v1300_v2  ;;  %v1305_v7 = vld [vmem:[#allocation5 + $0x88] sm:$0xff]   ;;  %v1308_v10 = vld [vmem:[#allocation5 + $0x10] sm:$0xff]   ;;  %v88_v29 = vunpack.c.0.s8 %v87_v23  ;;  %s1472_s30 = scalar_lea.vmem %s1049_s29, 32  ;;  %p1473_p5 = scmp.lt.s32.totalorder %s1049_s29, %s1049_s29 }
  0x4d   :  { %1165 = vmatpush3.bf16.msra.mxu1 %v1301_v3  ;;  %1144 = vmatprep.subr.bf16.mxu0 %v1302_v4  ;;  %v1309_v11 = vld [vmem:[#allocation5 + $0x90] sm:$0xff]   ;;  %v1310_v12 = vld [vmem:[#allocation5 + $0x58] sm:$0xff]   ;;  %v1314_v16 = vld [vmem:[#allocation5 + $0x60] sm:$0xff]  }
  0x4e   :  { %1166 = vmatprep.subr.bf16.mxu1 %v1303_v5  ;;  %v1311_v13 = vld [vmem:[#allocation5 + $0xd8] sm:$0xff]   ;;  %v1315_v17 = vld [vmem:[#allocation5 + $0xe0] sm:$0xff]   ;;  %v1318_v20 = vld [vmem:[#allocation5 + $0x68] sm:$0xff]   ;;  %v1605_v35 = vsub.s32 %v88_v29, %v90_v30 }
  0x4f   :  { %v1312_v14 = vld [vmem:[#allocation5 + $0x18] sm:$0xff]   ;;  %v1316_v18 = vld [vmem:[#allocation5 + $0x20] sm:$0xff]   ;;  %v1319_v21 = vld [vmem:[#allocation5 + $0xe8] sm:$0xff]  }
  0x50   :  { %1145 = vmatpush3.bf16.msra.mxu0 %v1304_v6  ;;  %v1313_v15 = vld [vmem:[#allocation5 + $0x98] sm:$0xff]   ;;  %v1317_v19 = vld [vmem:[#allocation5 + $0xa0] sm:$0xff]   ;;  %v1320_v25 = vld [vmem:[#allocation5 + $0x28] sm:$0xff]  }
  0x51   :  { %1167 = vmatpush3.bf16.msra.mxu1 %v1305_v7  ;;  %1146 = vmatprep.subr.bf16.mxu0 %v1306_v8  ;;  %v1321_v26 = vld [vmem:[#allocation5 + $0xa8] sm:$0xff]   ;;  %v1322_v27 = vld [vmem:[#allocation5 + $0x70] sm:$0xff]   ;;  %v1326_v33 = vld [vmem:[#allocation5 + $0x78] sm:$0xff]  }
  0x52   :  { %1168 = vmatprep.subr.bf16.mxu1 %v1307_v9  ;;  %v1323_v28 = vld [vmem:[#allocation5 + $0xf0] sm:$0xff]   ;;  %v1327_v34 = vld [vmem:[#allocation5 + $0xf8] sm:$0xff]   ;;  %v1331_v41 = vld [vmem:[#allocation5 + $0x140] sm:$0xff]  }
  0x53   :  { %v1324_v31 = vld [vmem:[#allocation5 + $0x30] sm:$0xff]   ;;  %v1328_v36 = vld [vmem:[#allocation5 + $0x38] sm:$0xff]   ;;  %v1332_v42 = vld [vmem:[#allocation5 + $0x1c0] sm:$0xff]  }
  0x54   :  { %1147 = vmatpush3.bf16.msra.mxu0 %v1308_v10  ;;  %v1325_v32 = vld [vmem:[#allocation5 + $0xb0] sm:$0xff]   ;;  %v1329_v37 = vld [vmem:[#allocation5 + $0xb8] sm:$0xff]   ;;  %v1333_v46 = vld [vmem:[#allocation5 + $0x100] sm:$0xff]  }
  0x55   :  { %1169 = vmatpush3.bf16.msra.mxu1 %v1309_v11  ;;  %1148 = vmatprep.subr.bf16.mxu0 %v1310_v12  ;;  %v81_v38 = vld [vmem:[#allocation2] sm:$0xff]  ;;  %v1334_v49 = vld [vmem:[#allocation5 + $0x180] sm:$0xff]   ;;  %v1335_v51 = vld [vmem:[#allocation5 + $0x148] sm:$0xff]  }
  0x56   :  { %1170 = vmatprep.subr.bf16.mxu1 %v1311_v13  ;;  %v92_v39 = vrot.slane %v81_v38, %v1605_v35  ;;  %v85_v40 = vcombine.high %v81_v38, %v81_v38  ;;  %v1336_v53 = vld [vmem:[#allocation5 + $0x1c8] sm:$0xff]   ;;  %v1339_v56 = vld [vmem:[#allocation5 + $0x150] sm:$0xff]   ;;  %v1343_v60 = vld [vmem:[#allocation5 + $0x158] sm:$0xff]  }
  0x57   :  { %v1337_v54 = vld [vmem:[#allocation5 + $0x108] sm:$0xff]   ;;  %v1340_v57 = vld [vmem:[#allocation5 + $0x1d0] sm:$0xff]   ;;  %v1344_v61 = vld [vmem:[#allocation5 + $0x1d8] sm:$0xff]  }
  0x58   :  { %1149 = vmatpush3.bf16.msra.mxu0 %v1312_v14  ;;  %v100_v43 = vcombine.high %v92_v39, %v92_v39  ;;  %v99_v44 = vrot.slane %v85_v40, %v1605_v35  ;;  %v127_v45 = vpack.c.bf16 %v92_v39, %v92_v39  ;;  %v1338_v55 = vld [vmem:[#allocation5 + $0x188] sm:$0xff]   ;;  %v1341_v58 = vld [vmem:[#allocation5 + $0x110] sm:$0xff]   ;;  %v1345_v62 = vld [vmem:[#allocation5 + $0x118] sm:$0xff]  }
  0x59   :  { %1171 = vmatpush3.bf16.msra.mxu1 %v1313_v15  ;;  %1150 = vmatprep.subr.bf16.mxu0 %v1314_v16  ;;  %v1342_v59 = vld [vmem:[#allocation5 + $0x190] sm:$0xff]   ;;  %v1346_v63 = vld [vmem:[#allocation5 + $0x198] sm:$0xff]   ;;  %v1347_v0 = vld [vmem:[#allocation5 + $0x160] sm:$0xff]  }
  0x5a   :  { %1172 = vmatprep.subr.bf16.mxu1 %v1315_v17  ;;  %v128_v47 = vpack.c.bf16 %v100_v43, %v100_v43  ;;  %v101_v48 = vcombine.high %v99_v44, %v99_v44  ;;  %v129_v50 = vpack.c.bf16 %v99_v44, %v99_v44  ;;  %v1348_v1 = vld [vmem:[#allocation5 + $0x1e0] sm:$0xff]   ;;  %v1351_v4 = vld [vmem:[#allocation5 + $0x168] sm:$0xff]   ;;  %v1355_v8 = vld [vmem:[#allocation5 + $0x170] sm:$0xff]  }
  0x5b   :  { %v1349_v2 = vld [vmem:[#allocation5 + $0x120] sm:$0xff]   ;;  %v1352_v5 = vld [vmem:[#allocation5 + $0x1e8] sm:$0xff]   ;;  %v1356_v9 = vld [vmem:[#allocation5 + $0x1f0] sm:$0xff]  }
  0x5c   :  { %1151 = vmatpush3.bf16.msra.mxu0 %v1316_v18  ;;  %686 = vmatprep.mubr.bf16.mxu0 %v128_v47  ;;  %v130_v52 = vpack.c.bf16 %v101_v48, %v101_v48  ;;  %v1350_v3 = vld [vmem:[#allocation5 + $0x1a0] sm:$0xff]   ;;  %v1353_v6 = vld [vmem:[#allocation5 + $0x128] sm:$0xff]   ;;  %v1357_v10 = vld [vmem:[#allocation5 + $0x130] sm:$0xff]  }
  0x5d   :  { %1173 = vmatpush3.bf16.msra.mxu1 %v1317_v19  ;;  %1152 = vmatprep.subr.bf16.mxu0 %v1318_v20  ;;  %v1354_v7 = vld [vmem:[#allocation5 + $0x1a8] sm:$0xff]   ;;  %v1358_v11 = vld [vmem:[#allocation5 + $0x1b0] sm:$0xff]   ;;  %v1359_v12 = vld [vmem:[#allocation5 + $0x178] sm:$0xff]  }
  0x5e   :  { %1174 = vmatprep.subr.bf16.mxu1 %v1319_v21  ;;  %726 = vmatprep.mubr.bf16.mxu1 %v130_v52  ;;  %v1360_v13 = vld [vmem:[#allocation5 + $0x1f8] sm:$0xff]   ;;  %v1366_v29 = vld [vmem:[#allocation7 + $0x10] sm:$0xff]   ;;  %v1376_v39 = vld [vmem:[#allocation8 + $0x20] sm:$0xff]  }
  0x5f   :  { %v1361_v14 = vld [vmem:[#allocation5 + $0x138] sm:$0xff]   ;;  %v1377_v40 = vld [vmem:[#allocation8 + $0x28] sm:$0xff]  }
  0x60   :  { %1153 = vmatpush3.bf16.msra.mxu0 %v1320_v25  ;;  %v82_v15 = vld [vmem:[#allocation2 + $0x8] sm:$0xff] }
  0x61   :  { %1175 = vmatpush3.bf16.msra.mxu1 %v1321_v26  ;;  %1154 = vmatprep.subr.bf16.mxu0 %v1322_v27  ;;  %v1362_v16 = vld [vmem:[#allocation5 + $0x1b8] sm:$0xff]   ;;  %v109_v17 = vrot.slane %v82_v15, %v1605_v35  ;;  %v102_v18 = vcombine.high %v82_v15, %v82_v15  ;;  %v1364_v26 = vld [vmem:[#allocation7] sm:$0xff]   ;;  %v1505_v27 = vmov 0.0  }
  0x62   :  { %1176 = vmatprep.subr.bf16.mxu1 %v1323_v28  ;;  %v1365_v28 = vld [vmem:[#allocation7 + $0x8] sm:$0xff]   ;;  %v1367_v30 = vld [vmem:[#allocation7 + $0x18] sm:$0xff]  }
  0x63   :  { %v117_v19 = vcombine.high %v109_v17, %v109_v17  ;;  %v116_v20 = vrot.slane %v102_v18, %v1605_v35  ;;  %v131_v21 = vpack.c.bf16 %v109_v17, %v109_v17  ;;  %v1372_v35 = vld [vmem:[#allocation8] sm:$0xff]   ;;  %v1375_v38 = vld [vmem:[#allocation8 + $0x18] sm:$0xff]  }
  0x64   :  { %1155 = vmatpush3.bf16.msra.mxu0 %v1324_v31  ;;  %v1368_v31 = vld [vmem:[#allocation7 + $0x20] sm:$0xff]  }
  0x65   :  { %1177 = vmatpush3.bf16.msra.mxu1 %v1325_v32  ;;  %1156 = vmatprep.subr.bf16.mxu0 %v1326_v33  ;;  %v132_v22 = vpack.c.bf16 %v117_v19, %v117_v19  ;;  %v118_v23 = vcombine.high %v116_v20, %v116_v20  ;;  %v133_v24 = vpack.c.bf16 %v116_v20, %v116_v20  ;;  %v1369_v32 = vld [vmem:[#allocation7 + $0x28] sm:$0xff]   ;;  %v1370_v33 = vld [vmem:[#allocation7 + $0x30] sm:$0xff]  }
  0x66   :  { %1178 = vmatprep.subr.bf16.mxu1 %v1327_v34  ;;  %v1371_v34 = vld [vmem:[#allocation7 + $0x38] sm:$0xff]  }
  0x67   :  { %v134_v25 = vpack.c.bf16 %v118_v23, %v118_v23 }
  0x68   :  { %1157 = vmatpush3.bf16.msra.mxu0 %v1328_v36  ;;  %v1373_v36 = vld [vmem:[#allocation8 + $0x8] sm:$0xff]  }
  0x69   :  { %1179 = vmatpush3.bf16.msra.mxu1 %v1329_v37  ;;  %1186 = vmatprep.subr.bf16.mxu0 %v1331_v41  ;;  %v1374_v37 = vld [vmem:[#allocation8 + $0x10] sm:$0xff]  }
  0x6a   :  { %1208 = vmatprep.subr.bf16.mxu1 %v1332_v42  ;;  %v1059_v42 = vld [vmem:[%s1652_s2] ss:$0 sm:$0xff] }
  0x6b   :  { %687 = vmatmul.mubr.bf16.vlgmr.msra.gmra.mrb[0].mxu0 %v127_v45 }
  0x6c   :  { %1187 = vmatpush3.bf16.msra.mxu0 %v1333_v46  ;;  %727 = vmatmul.mubr.bf16.vlgmr.msra.gmra.mrb[0].mxu1 %v129_v50 }
  0x6d   :  { %1188 = vmatprep.subr.bf16.mxu0 %v1335_v51  ;;  %1209 = vmatpush3.bf16.msra.mxu1 %v1334_v49 }
  0x6e   :  { %1210 = vmatprep.subr.bf16.mxu1 %v1336_v53  ;;  %766 = vmatprep.mubr.bf16.mxu0 %v132_v22 }
  0x6f   :  { %806 = vmatprep.mubr.bf16.mxu1 %v134_v25 }
  0x70   :  { %1189 = vmatpush3.bf16.msra.mxu0 %v1337_v54 }
  0x71   :  { %1190 = vmatprep.subr.bf16.mxu0 %v1339_v56  ;;  %1211 = vmatpush3.bf16.msra.mxu1 %v1338_v55 }
  0x72   :  { %1212 = vmatprep.subr.bf16.mxu1 %v1340_v57 }
  0x74   :  { %1191 = vmatpush3.bf16.msra.mxu0 %v1341_v58 }
  0x75   :  { %1192 = vmatprep.subr.bf16.mxu0 %v1343_v60  ;;  %1213 = vmatpush3.bf16.msra.mxu1 %v1342_v59 }
  0x76   :  { %1214 = vmatprep.subr.bf16.mxu1 %v1344_v61 }
  0x78   :  { %1193 = vmatpush3.bf16.msra.mxu0 %v1345_v62 }
  0x79   :  { %1194 = vmatprep.subr.bf16.mxu0 %v1347_v0  ;;  %1215 = vmatpush3.bf16.msra.mxu1 %v1346_v63 }
  0x7a   :  { %1216 = vmatprep.subr.bf16.mxu1 %v1348_v1 }
  0x7c   :  { %1195 = vmatpush3.bf16.msra.mxu0 %v1349_v2 }
  0x7d   :  { %1196 = vmatprep.subr.bf16.mxu0 %v1351_v4  ;;  %1217 = vmatpush3.bf16.msra.mxu1 %v1350_v3  ;;  %v1378_v4 = vld [vmem:[#allocation8 + $0x30] sm:$0xff]  }
  0x7e   :  { %1218 = vmatprep.subr.bf16.mxu1 %v1352_v5  ;;  %v1379_v5 = vld [vmem:[#allocation8 + $0x38] sm:$0xff]  }
  0x80   :  { %1197 = vmatpush3.bf16.msra.mxu0 %v1353_v6  ;;  %v1124_v6 = vld [vmem:[%s1654_s4] ss:$0 sm:$0xff]  ;;  %s1468_s4 = scalar_lea.vmem %s1049_s29, 16 }
  0x81   :  { %1198 = vmatprep.subr.bf16.mxu0 %v1355_v8  ;;  %1219 = vmatpush3.bf16.msra.mxu1 %v1354_v7  ;;  %p1469_p4 = scmp.ne.s32.totalorder %s1049_s29, %s1468_s4  ;;  %p1474_p6 = scmp.lt.s32.totalorder %s1472_s30, %s1468_s4 }
  0x82   :  { %1220 = vmatprep.subr.bf16.mxu1 %v1356_v9 }
  0x83   :  { %p1475_p7 = por %p1474_p6, %p1473_p5 }
  0x84   :  { %1199 = vmatpush3.bf16.msra.mxu0 %v1357_v10 }
  0x85   :  { %1200 = vmatprep.subr.bf16.mxu0 %v1359_v12  ;;  %1221 = vmatpush3.bf16.msra.mxu1 %v1358_v11  ;;  %p1476_p8 = pnand %p1475_p7, %p1469_p4 }
  0x86   :  { %1222 = vmatprep.subr.bf16.mxu1 %v1360_v13 }
  0x88   :  { %1201 = vmatpush3.bf16.msra.mxu0 %v1361_v14  ;;  %v1133_v14 = vld [vmem:[%s1656_s6] ss:$0 sm:$0xff] }
  0x89   :  { %1223 = vmatpush3.bf16.msra.mxu1 %v1362_v16  ;;  %1248 = vmatprep.subr.bf16.mxu0 %v1505_v27 }
  0x8a   :  { %1268 = vmatprep.subr.bf16.mxu1 %v1505_v27 }
  0x8b   :  { %767 = vmatmul.mubr.bf16.vlgmr.msra.gmra.mrb[4].mxu0 %v131_v21 }
  0x8c   :  { %807 = vmatmul.mubr.bf16.vlgmr.msra.gmra.mrb[4].mxu1 %v133_v24  ;;  %1249 = vmatpush3.bf16.msra.mxu0 %v1364_v26 }
  0x8d   :  { %1250 = vmatprep.subr.bf16.mxu0 %v1505_v27  ;;  %1264 = vmatprep.mubr.msk.bf16.mxu0 %vm1506_vm0, %v1505_v27 }
  0x8e   :  { %1284 = vmatprep.mubr.msk.bf16.mxu1 %vm1506_vm0, %v1505_v27  ;;  %1269 = vmatpush3.bf16.msra.mxu1 %v1372_v35 }
  0x8f   :  { %1270 = vmatprep.subr.bf16.mxu1 %v1505_v27 }
  0x90   :  { %1251 = vmatpush3.bf16.msra.mxu0 %v1365_v28 }
  0x91   :  { %1252 = vmatprep.subr.bf16.mxu0 %v1505_v27 }
  0x92   :  { %1271 = vmatpush3.bf16.msra.mxu1 %v1373_v36 }
  0x93   :  { %1272 = vmatprep.subr.bf16.mxu1 %v1505_v27 }
  0x94   :  { %1253 = vmatpush3.bf16.msra.mxu0 %v1366_v29 }
  0x95   :  { %1254 = vmatprep.subr.bf16.mxu0 %v1505_v27 }
  0x96   :  { %1273 = vmatpush3.bf16.msra.mxu1 %v1374_v37 }
  0x97   :  { %1274 = vmatprep.subr.bf16.mxu1 %v1505_v27 }
  0x98   :  { %1255 = vmatpush3.bf16.msra.mxu0 %v1367_v30 }
  0x99   :  { %1256 = vmatprep.subr.bf16.mxu0 %v1505_v27 }
  0x9a   :  { %1275 = vmatpush3.bf16.msra.mxu1 %v1375_v38 }
  0x9b   :  { %1276 = vmatprep.subr.bf16.mxu1 %v1505_v27 }
  0x9c   :  { %1257 = vmatpush3.bf16.msra.mxu0 %v1368_v31 }
  0x9d   :  { %1258 = vmatprep.subr.bf16.mxu0 %v1505_v27 }
  0x9e   :  { %1277 = vmatpush3.bf16.msra.mxu1 %v1376_v39 }
  0x9f   :  { %1278 = vmatprep.subr.bf16.mxu1 %v1505_v27 }
  0xa0   :  { %1259 = vmatpush3.bf16.msra.mxu0 %v1369_v32 }
  0xa1   :  { %1260 = vmatprep.subr.bf16.mxu0 %v1505_v27 }
  0xa2   :  { %1279 = vmatpush3.bf16.msra.mxu1 %v1377_v40 }
  0xa3   :  { %1280 = vmatprep.subr.bf16.mxu1 %v1505_v27 }
  0xa4   :  { %1261 = vmatpush3.bf16.msra.mxu0 %v1370_v33 }
  0xa5   :  { %1262 = vmatprep.subr.bf16.mxu0 %v1505_v27 }
  0xa6   :  { %1281 = vmatpush3.bf16.msra.mxu1 %v1378_v4 }
  0xa7   :  { %1282 = vmatprep.subr.bf16.mxu1 %v1505_v27 }
  0xa8   :  { %1263 = vmatpush3.bf16.msra.mxu0 %v1371_v34 }
  0xaa   :  { %1283 = vmatpush3.bf16.msra.mxu1 %v1379_v5 }
 0x13e   :  { %v1158_v41 = vpop.f32.mrb[0].mxu0 }
 0x13f   :  { %v1159_v43 = vpop.f32.mrb[1].mxu0  ;;  %v1180_v44 = vpop.f32.mrb[0].mxu1 }
 0x140   :  { %v1160_v45 = vadd.f32 %v1159_v43, %v1158_v41  ;;  %v1161_v46 = vpop.f32.mrb[2].mxu0  ;;  %v1181_v47 = vpop.f32.mrb[1].mxu1 }
 0x141   :  { %v1162_v48 = vpop.f32.mrb[3].mxu0  ;;  %v1182_v50 = vadd.f32 %v1181_v47, %v1180_v44  ;;  %v1183_v51 = vpop.f32.mrb[2].mxu1 }
 0x142   :  { %v689_v49 = vadd.f32 %v1160_v45, %v1059_v42  ;;  %v1184_v52 = vpop.f32.mrb[3].mxu1 }
 0x144   :  { %v729_v53 = vadd.f32 %v1182_v50, %v689_v49 }
 0x15e   :  { %v1202_v54 = vpop.f32.mrb[4].mxu0 }
 0x15f   :  { %v1203_v55 = vpop.f32.mrb[5].mxu0  ;;  %v1224_v56 = vpop.f32.mrb[4].mxu1 }
 0x160   :  { %v1204_v57 = vadd.f32 %v1203_v55, %v1202_v54  ;;  %v1205_v58 = vpop.f32.mrb[6].mxu0  ;;  %v1225_v59 = vpop.f32.mrb[5].mxu1 }
 0x161   :  { %v1206_v60 = vpop.f32.mrb[7].mxu0  ;;  %v1226_v62 = vadd.f32 %v1225_v59, %v1224_v56  ;;  %v1227_v63 = vpop.f32.mrb[6].mxu1 }
 0x162   :  { %v769_v61 = vadd.f32 %v1204_v57, %v729_v53  ;;  %v1228_v0 = vpop.f32.mrb[7].mxu1 }
 0x164   :  { %v809_v1 = vadd.f32 %v1226_v62, %v769_v61 }
 0x166   :  { %v814_v2 = vmax.f32 %v809_v1, 0.0 }
 0x168   :  { %v815_v3 = vpack.c.bf16 %v814_v2, %v814_v2 }
 0x16a   :  { %1265 = vmatmul.mubr.bf16.vlgmr.msra.gmra.mrb[8].mxu0 %v815_v3 }
 0x23d   :  { %v921_v7 = vpop.f32.mrb[8].mxu0 }
 0x23e   :  { %v922_v8 = vadd.f32 %v1124_v6, %v921_v7  ;;  %v1266_v9 = vpop.f32.mrb[9].mxu0 }
 0x23f   :  { %v924_v10 = vpop.f32.mrb[10].mxu0 }
 0x240   :  { %v927_v11 = vmax.f32 %v922_v8, 0.0  ;;  %v1267_v12 = vpop.f32.mrb[11].mxu0 }
 0x242   :  { %v928_v13 = vpack.c.bf16 %v927_v11, %v927_v11 }
 0x244   :  { %1285 = vmatmul.mubr.bf16.vlgmr.msra.gmra.mrb[8].mxu1 %v928_v13 }
 0x317   :  { %v1034_v15 = vpop.f32.mrb[8].mxu1 }
 0x318   :  { %v1035_v16 = vadd.f32 %v1133_v14, %v1034_v15  ;;  %v1286_v17 = vpop.f32.mrb[9].mxu1 }
 0x319   :  { %v1037_v18 = vpop.f32.mrb[10].mxu1 }
 0x31a   :  { %v1040_v19 = vpack.c.bf16 %v1035_v16, %v1035_v16  ;;  %v1287_v20 = vpop.f32.mrb[11].mxu1 }
 0x31c   :  { %1041 = vst [vmem:[#allocation10] sm:$0x1] %v1040_v19 }
 0x31d   :  { %1479 = shalt.err (!%p1476_p8)
}
 0x31e   :  { %s1480_s9 = scalar_lea.hbm %s1657_s7, 16 }
 0x31f   :  { %p1481_p9 = scmp.ne.s32.totalorder %s1657_s7, %s1480_s9  ;;  %p1484_p10 = scmp.lt.u32.totalorder %s1480_s9, %s1657_s7 }
 0x321   :  { %p1486_p11 = pnand %p1484_p10, %p1481_p9 }
 0x323   :  { %1489 = shalt.err (!%p1486_p11)
}
 0x324   :  { %1051 = dma.vmem_to_hbm [thread:$0]  %s1049_s29, 16, %s1657_s7, [#allocation4]  }
 0x325   :  { %1496 = dma.done.wait [#allocation4], 16  }
 0x326   :  { %1497 = vsyncadd [#allocation4], 4294967280 }
 0x327   :  { %1055 = vsyncpa [#allocation3], 1 }
 0x328   :  { %1056 = vsyncpa [#allocation6], 1 }
 0x329   :  { %1057 = vsyncpa [#allocation9], 1 }
 0x32a   :  { %1058 = vsyncpa [#allocation4], 1 }

</bundles_post_ra>
